<compile_context>
chip_gen: v7x
topology: tpu7x:2x2x1
jax: 0.10.0
libtpu: 0.0.40
codegen_flags: <defaults>
</compile_context>

<pallas_src>
import jax
import jax.numpy as jnp
from jax.experimental import pallas as pl
from jax.experimental.pallas import tpu as pltpu

N_ADJ = 4            # CircConv n_adj -> kernel_size = 2*n_adj + 1 = 9
EPS = 1e-5           # nn.BatchNorm1d default eps


def conv_relu_stats_kernel(x_ref, w_ref, b_ref, y_ref, stats_ref):
    """Circular Conv1d + bias + ReLU + partial BN stats, entirely in NCL layout.

    x_ref    : (TB, Cin, L)   f32  input tile (original NCL layout; cast to bf16 in-register)
    w_ref    : (K, Cout, Cin) bf16 conv weight, re-laid-out once at trace time
    b_ref    : (Cout, 1)      f32  conv bias
    y_ref    : (TB, Cout, L)  bf16 ReLU(conv(x)) tile (NCL, lane axis = L)
    stats_ref: (1, Cout, 2)   f32  per-tile [sum, sum_of_squares] over (TB, L)
    """
    TB, Cin, L = x_ref.shape
    K, Cout, _ = w_ref.shape
    n = (K - 1) // 2

    w = w_ref[...]                                  # (K, Cout, Cin) bf16, loaded once
    bias = b_ref[...].astype(jnp.float32)           # (Cout, 1), broadcast hoisted once

    s_acc = jnp.zeros((Cout, 1), jnp.float32)
    ss_acc = jnp.zeros((Cout, 1), jnp.float32)

    # Static unroll over the (small) batch tile; all halo handling is in-register rolls of the
    # resident (Cin, L) slice, so no padded DMAs and no extra HBM traffic for the wrap-around.
    for b in range(TB):
        xb = x_ref[b].astype(jnp.bfloat16)           # (Cin, L) cast once; MXU is bf16-native
        acc = jnp.zeros((Cout, L), jnp.float32)
        for k in range(K):                           # static, fully unrolled (K = 9)
            # output[:, l] needs x[:, (l + k - n) mod L]  ->  roll by (n - k) along L.
            xk = xb if k == n else jnp.roll(xb, n - k, axis=1)
            acc = acc + jnp.dot(w[k], xk, preferred_element_type=jnp.float32)

        y = jnp.maximum(acc + bias, 0.0)             # (Cout, L) f32
        y_ref[b] = y.astype(y_ref.dtype)             # bf16 writeback (halves HBM bytes)

        # BN partials from the f32 accumulator (before the bf16 downcast).
        s_acc = s_acc + jnp.sum(y, axis=1, keepdims=True)        # (Cout, 1)
        ss_acc = ss_acc + jnp.sum(y * y, axis=1, keepdims=True)  # (Cout, 1)

    # Direct row writes (no in-kernel concatenate).
    stats_ref[:, :, 0:1] = s_acc.reshape(1, Cout, 1)
    stats_ref[:, :, 1:2] = ss_acc.reshape(1, Cout, 1)


def bn_apply_kernel(y_ref, scale_ref, shift_ref, o_ref):
    """Apply precomputed affine BatchNorm and emit the final NCL f32 output in one pass."""
    y = y_ref[...].astype(jnp.float32)               # (TB, Cout, L)
    o_ref[...] = (y * scale_ref[...] + shift_ref[...]).astype(o_ref.dtype)


def _pick_block_b(B, Cin, Cout, L, *, budget_bytes=2 * 1024 * 1024, max_block_b=16):
    """Largest divisor of B whose double-buffered tile footprint fits the budget, keeping
    nb = B/block_b >= 2 so the 'parallel' axis can shard across v7x's two TensorCores."""
    per_b = 2 * (Cin * L * 4 + Cout * L * 2)          # in f32 + out bf16, double-buffered
    best = 1
    for bb in range(1, min(B, max_block_b) + 1):
        if B % bb:
            continue
        if B >= 2 and (B // bb) < 2:
            continue
        if bb * per_b <= budget_bytes:
            best = bb
    return best


def basic_block(x, w, bias, gamma, beta, *, block_b=None):
    """Fused CircConv + ReLU + BatchNorm1d (training batch statistics).

    x: (B, Cin, L) NCL (PyTorch layout); returns (B, Cout, L) NCL.
    """
    B, Cin, L = x.shape
    Cout, _, K = w.shape

    if block_b is None:
        block_b = _pick_block_b(B, Cin, Cout, L)
    assert B % block_b == 0, "block_b must divide the batch"
    nb = B // block_b

    # Only the tiny parameters get re-laid-out in XLA; activations never take an extra XLA pass.
    w_koi = jnp.transpose(w, (2, 0, 1)).astype(jnp.bfloat16)   # (K, Cout, Cin)
    b2 = bias.reshape(Cout, 1).astype(jnp.float32)

    cparams = pltpu.CompilerParams(
        dimension_semantics=("parallel",),      # batch tiles shard across the 2 TCs on v7x
        vmem_limit_bytes=48 * 1024 * 1024,      # <= v7x's 64 MiB physical; fine on v5e/v6e
    )

    # Pass 1: conv + bias + ReLU (bf16 y) + per-tile partial BN stats (f32).
    y, stats = pl.pallas_call(
        conv_relu_stats_kernel,
        out_shape=(
            jax.ShapeDtypeStruct((B, Cout, L), jnp.bfloat16),
            jax.ShapeDtypeStruct((nb, Cout, 2), jnp.float32),
        ),
        grid=(nb,),
        in_specs=[
            pl.BlockSpec((block_b, Cin, L), lambda i: (i, 0, 0)),
            pl.BlockSpec((K, Cout, Cin), lambda i: (0, 0, 0)),
            pl.BlockSpec((Cout, 1), lambda i: (0, 0)),
        ],
        out_specs=(
            pl.BlockSpec((block_b, Cout, L), lambda i: (i, 0, 0)),
            pl.BlockSpec((1, Cout, 2), lambda i: (i, 0, 0)),
        ),
        compiler_params=cparams,
    )(x.astype(jnp.float32), w_koi, b2)

    # Global BatchNorm statistics: tiny cross-tile reduction in XLA.
    count = jnp.float32(B * L)
    total = jnp.sum(stats, axis=0)                    # (Cout, 2)
    mean = total[:, 0] / count
    var = jnp.maximum(total[:, 1] / count - mean * mean, 0.0)   # biased (training) variance
    scale = gamma.astype(jnp.float32) * jax.lax.rsqrt(var + EPS)
    shift = beta.astype(jnp.float32) - mean * scale
    # TODO(synk): nn.BatchNorm1d running_mean/running_var buffer updates are not emitted
    # (the training-mode forward output does not depend on them).

    # Pass 2: single streaming affine pass, writes the final NCL f32 output directly.
    out = pl.pallas_call(
        bn_apply_kernel,
        out_shape=jax.ShapeDtypeStruct((B, Cout, L), jnp.float32),
        grid=(nb,),
        in_specs=[
            pl.BlockSpec((block_b, Cout, L), lambda i: (i, 0, 0)),
            pl.BlockSpec((1, Cout, 1), lambda i: (0, 0, 0)),
            pl.BlockSpec((1, Cout, 1), lambda i: (0, 0, 0)),
        ],
        out_specs=pl.BlockSpec((block_b, Cout, L), lambda i: (i, 0, 0)),
        compiler_params=cparams,
    )(y, scale.reshape(1, Cout, 1), shift.reshape(1, Cout, 1))

    return out


def basic_block_ref(x, w, bias, gamma, beta):
    """Pure-JAX reference for sanity checking."""
    n = N_ADJ
    xp = jnp.concatenate([x[..., -n:], x, x[..., :n]], axis=-1)
    y = jax.lax.conv_general_dilated(
        xp, w, window_strides=(1,), padding='VALID',
        dimension_numbers=('NCH', 'OIH', 'NCH'),
        precision=jax.lax.Precision.HIGHEST)
    y = y + bias[None, :, None]
    y = jnp.maximum(y, 0.0)
    mean = jnp.mean(y, axis=(0, 2), keepdims=True)
    var = jnp.mean((y - mean) ** 2, axis=(0, 2), keepdims=True)
    return (y - mean) / jnp.sqrt(var + EPS) * gamma[None, :, None] + beta[None, :, None]


if __name__ == "__main__":
    B, Cin, Cout, L = 2, 4, 4, 16
    K = 2 * N_ADJ + 1

    key = jax.random.PRNGKey(0)
    kx, kw, kb = jax.random.split(key, 3)

    x = jax.random.normal(kx, (B, Cin, L), dtype=jnp.float32)

    # Param init matching nn.Conv1d(Cin, Cout, 9) + BatchNorm1d(Cout) defaults.
    fan_in = Cin * K
    bound = 1.0 / (fan_in ** 0.5)
    w = jax.random.uniform(kw, (Cout, Cin, K), jnp.float32, -bound, bound)
    bias = jax.random.uniform(kb, (Cout,), jnp.float32, -bound, bound)
    gamma = jnp.ones((Cout,), jnp.float32)
    beta = jnp.zeros((Cout,), jnp.float32)

    out = basic_block(x, w, bias, gamma, beta)
    jax.block_until_ready(out)

    ref = basic_block_ref(x, w, bias, gamma, beta)
    assert out.shape == (B, Cout, L)
    # bf16 MXU operands (f32 accumulation) => slightly looser tolerance than a HIGHEST-precision
    # f32 reference; well within training-useful accuracy.
    assert jnp.allclose(out, ref, atol=3e-2, rtol=3e-2)

    print("KERNEL_OK")
</pallas_src>

<mosaic_0001>
module attributes {stable_mosaic.version = 11 : i64} {
  func.func @conv_relu_stats_kernel(%arg0: i32, %arg1: memref<1x4x16xf32, #tpu.memory_space<vmem>>, %arg2: memref<9x4x4xbf16, #tpu.memory_space<vmem>>, %arg3: memref<4x1xf32, #tpu.memory_space<vmem>>, %arg4: memref<1x4x16xbf16, #tpu.memory_space<vmem>>, %arg5: memref<1x4x2xf32, #tpu.memory_space<vmem>>) attributes {dimension_semantics = [#tpu.dimension_semantics<parallel>], iteration_bounds = array<i64: 2>, scalar_prefetch = 0 : i64, scratch_operands = 0 : i64, tpu.core_type = #tpu.core_type<tc>, window_params = [{transform_indices = @transform_0, window_bounds = array<i64: 1, 4, 16>}, {pipeline_mode = #tpu.pipeline_mode<synchronous>, transform_indices = @transform_1, window_bounds = array<i64: 9, 4, 4>}, {pipeline_mode = #tpu.pipeline_mode<synchronous>, transform_indices = @transform_2, window_bounds = array<i64: 4, 1>}, {transform_indices = @transform_3, window_bounds = array<i64: 1, 4, 16>}, {transform_indices = @transform_4, window_bounds = array<i64: 1, 4, 2>}]} {
    %c0 = arith.constant 0 : index
    %c0_0 = arith.constant 0 : index
    %c0_1 = arith.constant 0 : index
    %0 = vector.load %arg2[%c0, %c0_0, %c0_1] : memref<9x4x4xbf16, #tpu.memory_space<vmem>>, vector<9x4x4xbf16>
    %c0_2 = arith.constant 0 : index
    %c0_3 = arith.constant 0 : index
    %1 = vector.load %arg3[%c0_2, %c0_3] : memref<4x1xf32, #tpu.memory_space<vmem>>, vector<4x1xf32>
    %cst = arith.constant 0.000000e+00 : f32
    %2 = vector.broadcast %cst : f32 to vector<4x1xf32>
    %cst_4 = arith.constant 0.000000e+00 : f32
    %3 = vector.broadcast %cst_4 : f32 to vector<4x1xf32>
    %c0_5 = arith.constant 0 : index
    %c0_6 = arith.constant 0 : index
    %c0_7 = arith.constant 0 : index
    %4 = vector.load %arg1[%c0_5, %c0_6, %c0_7] : memref<1x4x16xf32, #tpu.memory_space<vmem>>, vector<1x4x16xf32>
    %5 = vector.shape_cast %4 : vector<1x4x16xf32> to vector<4x16xf32>
    %6 = arith.truncf %5 : vector<4x16xf32> to vector<4x16xbf16>
    %cst_8 = arith.constant 0.000000e+00 : f32
    %7 = vector.broadcast %cst_8 : f32 to vector<4x16xf32>
    %8 = vector.extract_strided_slice %6 {offsets = [0, 12], sizes = [4, 4], strides = [1, 1]} : vector<4x16xbf16> to vector<4x4xbf16>
    %9 = vector.extract_strided_slice %6 {offsets = [0, 0], sizes = [4, 12], strides = [1, 1]} : vector<4x16xbf16> to vector<4x12xbf16>
    %10 = tpu.concatenate %8, %9 in 1 : vector<4x4xbf16>, vector<4x12xbf16> -> vector<4x16xbf16>
    %11 = vector.extract_strided_slice %0 {offsets = [0, 0, 0], sizes = [1, 4, 4], strides = [1, 1, 1]} : vector<9x4x4xbf16> to vector<1x4x4xbf16>
    %12 = vector.shape_cast %11 : vector<1x4x4xbf16> to vector<4x4xbf16>
    %cst_9 = arith.constant dense<0.000000e+00> : vector<4x16xf32>
    %13 = tpu.matmul %12, %10, %cst_9 {dimension_numbers = #tpu.dot_dimension_numbers<[1], [0], [0], [1], [0, 0, 1, 1], [], []>} : vector<4x4xbf16>, vector<4x16xbf16>, vector<4x16xf32> -> vector<4x16xf32>
    %14 = arith.addf %7, %13 : vector<4x16xf32>
    %15 = vector.extract_strided_slice %6 {offsets = [0, 13], sizes = [4, 3], strides = [1, 1]} : vector<4x16xbf16> to vector<4x3xbf16>
    %16 = vector.extract_strided_slice %6 {offsets = [0, 0], sizes = [4, 13], strides = [1, 1]} : vector<4x16xbf16> to vector<4x13xbf16>
    %17 = tpu.concatenate %15, %16 in 1 : vector<4x3xbf16>, vector<4x13xbf16> -> vector<4x16xbf16>
    %18 = vector.extract_strided_slice %0 {offsets = [1, 0, 0], sizes = [1, 4, 4], strides = [1, 1, 1]} : vector<9x4x4xbf16> to vector<1x4x4xbf16>
    %19 = vector.shape_cast %18 : vector<1x4x4xbf16> to vector<4x4xbf16>
    %cst_10 = arith.constant dense<0.000000e+00> : vector<4x16xf32>
    %20 = tpu.matmul %19, %17, %cst_10 {dimension_numbers = #tpu.dot_dimension_numbers<[1], [0], [0], [1], [0, 0, 1, 1], [], []>} : vector<4x4xbf16>, vector<4x16xbf16>, vector<4x16xf32> -> vector<4x16xf32>
    %21 = arith.addf %14, %20 : vector<4x16xf32>
    %22 = vector.extract_strided_slice %6 {offsets = [0, 14], sizes = [4, 2], strides = [1, 1]} : vector<4x16xbf16> to vector<4x2xbf16>
    %23 = vector.extract_strided_slice %6 {offsets = [0, 0], sizes = [4, 14], strides = [1, 1]} : vector<4x16xbf16> to vector<4x14xbf16>
    %24 = tpu.concatenate %22, %23 in 1 : vector<4x2xbf16>, vector<4x14xbf16> -> vector<4x16xbf16>
    %25 = vector.extract_strided_slice %0 {offsets = [2, 0, 0], sizes = [1, 4, 4], strides = [1, 1, 1]} : vector<9x4x4xbf16> to vector<1x4x4xbf16>
    %26 = vector.shape_cast %25 : vector<1x4x4xbf16> to vector<4x4xbf16>
    %cst_11 = arith.constant dense<0.000000e+00> : vector<4x16xf32>
    %27 = tpu.matmul %26, %24, %cst_11 {dimension_numbers = #tpu.dot_dimension_numbers<[1], [0], [0], [1], [0, 0, 1, 1], [], []>} : vector<4x4xbf16>, vector<4x16xbf16>, vector<4x16xf32> -> vector<4x16xf32>
    %28 = arith.addf %21, %27 : vector<4x16xf32>
    %29 = vector.extract_strided_slice %6 {offsets = [0, 15], sizes = [4, 1], strides = [1, 1]} : vector<4x16xbf16> to vector<4x1xbf16>
    %30 = vector.extract_strided_slice %6 {offsets = [0, 0], sizes = [4, 15], strides = [1, 1]} : vector<4x16xbf16> to vector<4x15xbf16>
    %31 = tpu.concatenate %29, %30 in 1 : vector<4x1xbf16>, vector<4x15xbf16> -> vector<4x16xbf16>
    %32 = vector.extract_strided_slice %0 {offsets = [3, 0, 0], sizes = [1, 4, 4], strides = [1, 1, 1]} : vector<9x4x4xbf16> to vector<1x4x4xbf16>
    %33 = vector.shape_cast %32 : vector<1x4x4xbf16> to vector<4x4xbf16>
    %cst_12 = arith.constant dense<0.000000e+00> : vector<4x16xf32>
    %34 = tpu.matmul %33, %31, %cst_12 {dimension_numbers = #tpu.dot_dimension_numbers<[1], [0], [0], [1], [0, 0, 1, 1], [], []>} : vector<4x4xbf16>, vector<4x16xbf16>, vector<4x16xf32> -> vector<4x16xf32>
    %35 = arith.addf %28, %34 : vector<4x16xf32>
    %36 = vector.extract_strided_slice %0 {offsets = [4, 0, 0], sizes = [1, 4, 4], strides = [1, 1, 1]} : vector<9x4x4xbf16> to vector<1x4x4xbf16>
    %37 = vector.shape_cast %36 : vector<1x4x4xbf16> to vector<4x4xbf16>
    %cst_13 = arith.constant dense<0.000000e+00> : vector<4x16xf32>
    %38 = tpu.matmul %37, %6, %cst_13 {dimension_numbers = #tpu.dot_dimension_numbers<[1], [0], [0], [1], [0, 0, 1, 1], [], []>} : vector<4x4xbf16>, vector<4x16xbf16>, vector<4x16xf32> -> vector<4x16xf32>
    %39 = arith.addf %35, %38 : vector<4x16xf32>
    %40 = vector.extract_strided_slice %6 {offsets = [0, 1], sizes = [4, 15], strides = [1, 1]} : vector<4x16xbf16> to vector<4x15xbf16>
    %41 = vector.extract_strided_slice %6 {offsets = [0, 0], sizes = [4, 1], strides = [1, 1]} : vector<4x16xbf16> to vector<4x1xbf16>
    %42 = tpu.concatenate %40, %41 in 1 : vector<4x15xbf16>, vector<4x1xbf16> -> vector<4x16xbf16>
    %43 = vector.extract_strided_slice %0 {offsets = [5, 0, 0], sizes = [1, 4, 4], strides = [1, 1, 1]} : vector<9x4x4xbf16> to vector<1x4x4xbf16>
    %44 = vector.shape_cast %43 : vector<1x4x4xbf16> to vector<4x4xbf16>
    %cst_14 = arith.constant dense<0.000000e+00> : vector<4x16xf32>
    %45 = tpu.matmul %44, %42, %cst_14 {dimension_numbers = #tpu.dot_dimension_numbers<[1], [0], [0], [1], [0, 0, 1, 1], [], []>} : vector<4x4xbf16>, vector<4x16xbf16>, vector<4x16xf32> -> vector<4x16xf32>
    %46 = arith.addf %39, %45 : vector<4x16xf32>
    %47 = vector.extract_strided_slice %6 {offsets = [0, 2], sizes = [4, 14], strides = [1, 1]} : vector<4x16xbf16> to vector<4x14xbf16>
    %48 = vector.extract_strided_slice %6 {offsets = [0, 0], sizes = [4, 2], strides = [1, 1]} : vector<4x16xbf16> to vector<4x2xbf16>
    %49 = tpu.concatenate %47, %48 in 1 : vector<4x14xbf16>, vector<4x2xbf16> -> vector<4x16xbf16>
    %50 = vector.extract_strided_slice %0 {offsets = [6, 0, 0], sizes = [1, 4, 4], strides = [1, 1, 1]} : vector<9x4x4xbf16> to vector<1x4x4xbf16>
    %51 = vector.shape_cast %50 : vector<1x4x4xbf16> to vector<4x4xbf16>
    %cst_15 = arith.constant dense<0.000000e+00> : vector<4x16xf32>
    %52 = tpu.matmul %51, %49, %cst_15 {dimension_numbers = #tpu.dot_dimension_numbers<[1], [0], [0], [1], [0, 0, 1, 1], [], []>} : vector<4x4xbf16>, vector<4x16xbf16>, vector<4x16xf32> -> vector<4x16xf32>
    %53 = arith.addf %46, %52 : vector<4x16xf32>
    %54 = vector.extract_strided_slice %6 {offsets = [0, 3], sizes = [4, 13], strides = [1, 1]} : vector<4x16xbf16> to vector<4x13xbf16>
    %55 = vector.extract_strided_slice %6 {offsets = [0, 0], sizes = [4, 3], strides = [1, 1]} : vector<4x16xbf16> to vector<4x3xbf16>
    %56 = tpu.concatenate %54, %55 in 1 : vector<4x13xbf16>, vector<4x3xbf16> -> vector<4x16xbf16>
    %57 = vector.extract_strided_slice %0 {offsets = [7, 0, 0], sizes = [1, 4, 4], strides = [1, 1, 1]} : vector<9x4x4xbf16> to vector<1x4x4xbf16>
    %58 = vector.shape_cast %57 : vector<1x4x4xbf16> to vector<4x4xbf16>
    %cst_16 = arith.constant dense<0.000000e+00> : vector<4x16xf32>
    %59 = tpu.matmul %58, %56, %cst_16 {dimension_numbers = #tpu.dot_dimension_numbers<[1], [0], [0], [1], [0, 0, 1, 1], [], []>} : vector<4x4xbf16>, vector<4x16xbf16>, vector<4x16xf32> -> vector<4x16xf32>
    %60 = arith.addf %53, %59 : vector<4x16xf32>
    %61 = vector.extract_strided_slice %6 {offsets = [0, 4], sizes = [4, 12], strides = [1, 1]} : vector<4x16xbf16> to vector<4x12xbf16>
    %62 = vector.extract_strided_slice %6 {offsets = [0, 0], sizes = [4, 4], strides = [1, 1]} : vector<4x16xbf16> to vector<4x4xbf16>
    %63 = tpu.concatenate %61, %62 in 1 : vector<4x12xbf16>, vector<4x4xbf16> -> vector<4x16xbf16>
    %64 = vector.extract_strided_slice %0 {offsets = [8, 0, 0], sizes = [1, 4, 4], strides = [1, 1, 1]} : vector<9x4x4xbf16> to vector<1x4x4xbf16>
    %65 = vector.shape_cast %64 : vector<1x4x4xbf16> to vector<4x4xbf16>
    %cst_17 = arith.constant dense<0.000000e+00> : vector<4x16xf32>
    %66 = tpu.matmul %65, %63, %cst_17 {dimension_numbers = #tpu.dot_dimension_numbers<[1], [0], [0], [1], [0, 0, 1, 1], [], []>} : vector<4x4xbf16>, vector<4x16xbf16>, vector<4x16xf32> -> vector<4x16xf32>
    %67 = arith.addf %60, %66 : vector<4x16xf32>
    %68 = vector.broadcast %1 : vector<4x1xf32> to vector<4x16xf32>
    %69 = arith.addf %67, %68 : vector<4x16xf32>
    %cst_18 = arith.constant 0.000000e+00 : f32
    %70 = vector.broadcast %cst_18 : f32 to vector<4x16xf32>
    %71 = arith.maximumf %69, %70 : vector<4x16xf32>
    %72 = arith.truncf %71 : vector<4x16xf32> to vector<4x16xbf16>
    %c0_19 = arith.constant 0 : index
    %c0_20 = arith.constant 0 : index
    %c0_21 = arith.constant 0 : index
    %73 = vector.load %arg4[%c0_19, %c0_20, %c0_21] : memref<1x4x16xbf16, #tpu.memory_space<vmem>>, vector<1x4x16xbf16>
    %74 = vector.shape_cast %73 : vector<1x4x16xbf16> to vector<4x16xbf16>
    %75 = vector.shape_cast %72 : vector<4x16xbf16> to vector<1x4x16xbf16>
    tpu.vector_store %arg4[%c0_19, %c0_20, %c0_21], %75 {strides = array<i32>} : memref<1x4x16xbf16, #tpu.memory_space<vmem>>, vector<1x4x16xbf16>,
    %cst_22 = arith.constant dense<0.000000e+00> : vector<4xf32>
    %76 = vector.multi_reduction <add>, %71, %cst_22 [1] : vector<4x16xf32> to vector<4xf32>
    %77 = vector.shape_cast %76 : vector<4xf32> to vector<4x1xf32>
    %78 = arith.addf %2, %77 : vector<4x1xf32>
    %79 = arith.mulf %71, %71 : vector<4x16xf32>
    %cst_23 = arith.constant dense<0.000000e+00> : vector<4xf32>
    %80 = vector.multi_reduction <add>, %79, %cst_23 [1] : vector<4x16xf32> to vector<4xf32>
    %81 = vector.shape_cast %80 : vector<4xf32> to vector<4x1xf32>
    %82 = arith.addf %3, %81 : vector<4x1xf32>
    %83 = vector.shape_cast %78 : vector<4x1xf32> to vector<1x4x1xf32>
    %c0_24 = arith.constant 0 : index
    %c0_25 = arith.constant 0 : index
    %c0_26 = arith.constant 0 : index
    %84 = vector.load %arg5[%c0_24, %c0_25, %c0_26] : memref<1x4x2xf32, #tpu.memory_space<vmem>>, vector<1x4x1xf32>
    tpu.vector_store %arg5[%c0_24, %c0_25, %c0_26], %83 {strides = array<i32>} : memref<1x4x2xf32, #tpu.memory_space<vmem>>, vector<1x4x1xf32>,
    %85 = vector.shape_cast %82 : vector<4x1xf32> to vector<1x4x1xf32>
    %c0_27 = arith.constant 0 : index
    %c0_28 = arith.constant 0 : index
    %c1 = arith.constant 1 : index
    %86 = vector.load %arg5[%c0_27, %c0_28, %c1] : memref<1x4x2xf32, #tpu.memory_space<vmem>>, vector<1x4x1xf32>
    tpu.vector_store %arg5[%c0_27, %c0_28, %c1], %85 {strides = array<i32>} : memref<1x4x2xf32, #tpu.memory_space<vmem>>, vector<1x4x1xf32>,
    return
  }
  func.func @transform_0(%arg0: i32) -> (i32, i32, i32) {
    %c0_i32 = arith.constant 0 : i32
    %c0_i32_0 = arith.constant 0 : i32
    %c0_i32_1 = arith.constant 0 : i32
    return %arg0, %c0_i32, %c0_i32_0 : i32, i32, i32
  }
  func.func @transform_1(%arg0: i32) -> (i32, i32, i32) {
    %c0_i32 = arith.constant 0 : i32
    %c0_i32_0 = arith.constant 0 : i32
    %c0_i32_1 = arith.constant 0 : i32
    %c0_i32_2 = arith.constant 0 : i32
    return %c0_i32, %c0_i32_0, %c0_i32_1 : i32, i32, i32
  }
  func.func @transform_2(%arg0: i32) -> (i32, i32) {
    %c0_i32 = arith.constant 0 : i32
    %c0_i32_0 = arith.constant 0 : i32
    %c0_i32_1 = arith.constant 0 : i32
    return %c0_i32, %c0_i32_0 : i32, i32
  }
  func.func @transform_3(%arg0: i32) -> (i32, i32, i32) {
    %c0_i32 = arith.constant 0 : i32
    %c0_i32_0 = arith.constant 0 : i32
    %c0_i32_1 = arith.constant 0 : i32
    return %arg0, %c0_i32, %c0_i32_0 : i32, i32, i32
  }
  func.func @transform_4(%arg0: i32) -> (i32, i32, i32) {
    %c0_i32 = arith.constant 0 : i32
    %c0_i32_0 = arith.constant 0 : i32
    %c0_i32_1 = arith.constant 0 : i32
    return %arg0, %c0_i32, %c0_i32_0 : i32, i32, i32
  }
}

</mosaic_0001>

<bundles_post_ra>
// kernel: tpu_custom_call.1
= control target key start
LH: loop header
LB: loop body
LE: loop exit
PB: predicated region body
PF: predicated region fallthrough
CT: control target
= control target key end

     0   :  { %10 = vsyncpa [#allocation3], 0  ;;  %s1283_s0 = inlined_call_operand.vmem [shape: f32[2,4,16], index: 0, kind: input, shape index: {}]   ;;  %s1284_s1 = inlined_call_operand.vmem [shape: bf16[9,4,4], index: 1, kind: input, shape index: {}]   ;;  %s1285_s2 = inlined_call_operand.vmem [shape: f32[4,1], index: 2, kind: input, shape index: {}]   ;;  %s1286_s3 = inlined_call_operand.hbm [shape: bf16[2,4,16], index: 3, kind: output, shape index: {0}]   ;;  %s1287_s4 = inlined_call_operand.vmem [shape: f32[2,4,2], index: 4, kind: output, shape index: {1}]  }
   0x1   :  { %12 = vsyncpa [#allocation3 + $0x1], 0  ;;  %s1084_s15 = smov 0   ;;  %s1086_s16 = smov 0  }
   0x2   :  { %s1088_s17 = smov 0   ;;  %s1090_s18 = smov 0  }
   0x3 LB: > { %s1105_s19 = sadd.s32 4294967295, %s1037_s18   ;;  %s824_s20 = sadd.s32 4294967294, %s1037_s18   ;;  %s1037_s18 = sphi %s1090_s18, %s1293_s18   ;;  %s1033_s17 = sphi %s1088_s17, %s1292_s17   ;;  %s1029_s16 = sphi %s1086_s16, %s1291_s16   ;;  %s1025_s15 = sphi %s1084_s15, %s1290_s15  }
   0x4   : > { %s1109_s21 = sadd.s32 1, %s1037_s18   ;;  %s93_s22 = sadd.s32 1, %s1033_s17 }
   0x5   : > { %s90_s23 = ssub.s32 %s1037_s18, %s1109_s21  ;;  %p103_p0 = scmp.ne.s32.totalorder %s1033_s17, %s1029_s16 }
   0x6   : > { %p91_p1 = scmp.eq.s32.totalorder %s90_s23, 0  ;;  %p104_p2 = scmp.eq.s32.totalorder %s1105_s19, 1 }
   0x7   : > { %p109_p3 = scmp.ne.s32.totalorder %s1029_s16, %s1025_s15  ;;  %p110_p4 = scmp.eq.s32.totalorder %s824_s20, 1 }
   0x8   : > { %s1120_s24 = scalar_select %p91_p1, %s1033_s17, %s93_s22  }
   0x9   : > { %p1122_p5 = por %p104_p2, %p103_p0  ;;  %p1126_p6 = por %p110_p4, %p109_p3 }
   0xa   : > { %p827_p7 = scmp.ge.s32.totalorder %s1037_s18, 1  ;;  %p167_p8 = scmp.lt.s32.totalorder %s1037_s18, 3 }
   0xc   : > { %p168_p9 = pnand %p827_p7, %p167_p8 }
   0xd   : > { %p196_p10 = scmp.lt.s32.totalorder (!%p168_p9), %s1105_s19, 1  ;;  %v1039_v0 = vmov (!%p168_p9), 0.0   ;;  %vm1040_vm0 = vmmov (!%p168_p9), 0   ;;  %s1041_s6 = smov (!%p168_p9), 116   ;;  %v1057_v3 = vmov (!%p168_p9), 0   ;;  %vm230_vm1 = vcmask (!%p168_p9), 23552  }
   0xe   : > { %171 = sbr.rel (%p168_p9) target bundleno = 548 (0x224), region = 32  ;;  %862 = vmatprep.subr.bf16.mxu0 (!%p168_p9), %v1039_v0  ;;  %868 = vmatprep.subr.bf16.mxu1 (!%p168_p9), %v1039_v0  ;;  %s1042_s7 = smov (!%p168_p9), 115   ;;  %v214_v4 = vld [vmem:[%s1285_s2] sm:$0xf] (!%p168_p9)  ;;  %vm222_vm2 = vcmask (!%p168_p9), 31744   ;;  %vm237_vm3 = vcmask (!%p168_p9), 1041408  }
   0xf   : > { %864 = vmatprep.mubr.msk.bf16.mxu0 (!%p168_p9), %vm1040_vm0, %v1039_v0  ;;  %870 = vmatprep.mubr.msk.bf16.mxu1 (!%p168_p9), %vm1040_vm0, %v1039_v0  ;;  %s1043_s8 = smov (!%p168_p9), 4   ;;  %s1044_s9 = smov (!%p168_p9), 3   ;;  %vm329_vm4 = vcmask (!%p168_p9), 15360   ;;  %v206_v13 = vld [vmem:[%s1284_s1 + $0x2] sm:$0x3] (!%p168_p9)  ;;  %vm383_vm5 = vcmask (!%p168_p9), 7168  }
  0x10   : > { %s1045_s10 = smov (!%p168_p9), 2   ;;  %s1046_s11 = smov (!%p168_p9), 114   ;;  %974 = vset.pattern.permute.xlu0 (!%p168_p9), %v1057_v3  ;;  %v205_v14 = vld [vmem:[%s1284_s1] sm:$0x3] (!%p168_p9)  ;;  %vm484_vm6 = vcmask (!%p168_p9), 121856   ;;  %vm538_vm7 = vcmask (!%p168_p9), 113664  }
  0x11   : > { %s1047_s12 = smov (!%p168_p9), 1   ;;  %s1048_s13 = smov (!%p168_p9), 113   ;;  %v207_v23 = vld [vmem:[%s1284_s1 + $0x4] sm:$0x3] (!%p168_p9)  ;;  %v208_v24 = vld [vmem:[%s1284_s1 + $0x6] sm:$0x3] (!%p168_p9) }
  0x12   : > { %s1049_s14 = smov (!%p168_p9), 15   ;;  %s1050_s20 = smov (!%p168_p9), 127   ;;  %vm592_vm8 = vcmask (!%p168_p9), 105472   ;;  %v209_v33 = vld [vmem:[%s1284_s1 + $0x8] sm:$0x3] (!%p168_p9)  ;;  %vm646_vm9 = vcmask (!%p168_p9), 97280  }
  0x13   : > { %s1051_s22 = smov (!%p168_p9), 14   ;;  %s1052_s23 = smov (!%p168_p9), 126   ;;  %v210_v34 = vld [vmem:[%s1284_s1 + $0xa] sm:$0x3] (!%p168_p9)  ;;  %v211_v43 = vld [vmem:[%s1284_s1 + $0xc] sm:$0x3] (!%p168_p9) }
  0x14   : > { %s1053_s29 = smov (!%p168_p9), 13   ;;  %s1054_s30 = smov (!%p168_p9), 125   ;;  %v212_v44 = vld [vmem:[%s1284_s1 + $0xe] sm:$0x3] (!%p168_p9)  ;;  %v213_v46 = vld [vmem:[%s1284_s1 + $0x10] sm:$0x3] (!%p168_p9) }
  0x15   : > { %s1136_s27 = scalar_select %p196_p10, %s1105_s19, 1  ;;  %vm706_vm10 = vcmask 125952   ;;  %vm704_vm11 = vcmask 123904  }
  0x17   : > { %s829_s28 = sshll.u32 %s1136_s27, 2 }
  0x18   : > { %s199_s5 = scalar_lea.vmem %s1283_s0, %s829_s28 }
  0x19   : > { %v215_v1 = vld [vmem:[%s199_s5] sm:$0xf]  ;;  %s1055_s5 = smov 12  }
  0x1a   : > { %v1148_v2 = vpack.c.bf16 %v215_v1, %v215_v1 }
  0x1c   : > { %218 = vrot.lane.b32.xlu1 %v1148_v2, %s1041_s6  ;;  %226 = vrot.lane.b32.xlu0 %v1148_v2, %s1042_s7  ;;  %s1056_s6 = smov 124   ;;  %v437_v25 = vsel %vm237_vm3, %v1148_v2, 0  ;;  %s1058_s7 = smov [#allocation2]  }
  0x20   : > { %220 = vrot.lane.b32.xlu1 %v1148_v2, %s1043_s8  ;;  %228 = vrot.lane.b32.xlu0 %v1148_v2, %s1044_s9  ;;  %s979_s8 = sshll.u32 %s1058_s7, 4  ;;  %s980_s8 = int_to_ptr.vmem [resolvable:$false] %s979_s8 }
  0x21   : > { %s981_s9 = scalar_lea.vmem %s980_s8, 64 }
  0x24   : > { %327 = vrot.lane.b32.xlu1 %v1148_v2, %s1045_s10  ;;  %325 = vrot.lane.b32.xlu0 %v1148_v2, %s1046_s11 }
  0x28   : > { %381 = vrot.lane.b32.xlu1 %v1148_v2, %s1047_s12  ;;  %379 = vrot.lane.b32.xlu0 %v1148_v2, %s1048_s13  ;;  %s187_s12 = sand.u32 1, %s1029_s16  }
  0x29   : > { %s828_s13 = sshll.u32 %s187_s12, 1 }
  0x2c   : > { %482 = vrot.lane.b32.xlu1 %v1148_v2, %s1049_s14  ;;  %480 = vrot.lane.b32.xlu0 %v1148_v2, %s1050_s20  ;;  %s189_s14 = scalar_lea.vmem [#allocation2], %s828_s13  ;;  %s841_s20 = sshll.u32 %s1105_s19, 5 }
  0x30   : > { %536 = vrot.lane.b32.xlu1 %v1148_v2, %s1051_s22  ;;  %534 = vrot.lane.b32.xlu0 %v1148_v2, %s1052_s23  ;;  %s738_s22 = sshll.u32 %s189_s14, 4  ;;  %s739_s22 = int_to_ptr.vmem [resolvable:$true] %s738_s22 }
  0x31   : > { %p982_p0 = scmp.lt.s32.totalorder %s739_s22, %s980_s8 }
  0x34   : > { %590 = vrot.lane.b32.xlu1 %v1148_v2, %s1053_s29  ;;  %588 = vrot.lane.b32.xlu0 %v1148_v2, %s1054_s30  ;;  %s1242_s30 = scalar_lea.hbm %s1286_s3, %s841_s20 }
  0x38   : > { %644 = vrot.lane.b32.xlu1 %v1148_v2, %s1055_s5  ;;  %642 = vrot.lane.b32.xlu0 %v1148_v2, %s1056_s6  ;;  %s721_s5 = scalar_lea.sflag [#allocation3], %s187_s12  ;;  %s975_s6 = scalar_lea.vmem %s739_s22, 32 }
  0x39   : > { %p976_p11 = scmp.ne.s32.totalorder %s739_s22, %s975_s6  ;;  %p983_p1 = scmp.lt.s32.totalorder %s981_s9, %s975_s6 }
  0x3b   : > { %p977_p12 = pnand %p976_p11, %p1122_p5  ;;  %p984_p2 = por %p983_p1, %p982_p0 }
  0x3c   : > { %698 = vperm.xlu0 %974, %v214_v4  }
  0x3d   : > { %p978_p13 = pneg %p977_p12 }
  0x3f   : > { %p985_p3 = pnand %p984_p2, %p978_p13 }
  0x8e   : > { %v219_v5 = vpop.permute.xlu1 %218  ;;  %v227_v6 = vpop.permute.xlu0 %226 }
  0x92   : > { %v221_v7 = vpop.permute.xlu1 %220  ;;  %v229_v8 = vpop.permute.xlu0 %228 }
  0x93   : > { %v233_v9 = vsel %vm230_vm1, %v227_v6, %v229_v8  ;;  %v225_v10 = vsel %vm222_vm2, %v219_v5, %v221_v7 }
  0x94   : > { %v238_v11 = vsel %vm237_vm3, %v233_v9, 0  ;;  %v283_v12 = vsel %vm237_vm3, %v225_v10, 0 }
  0x95   : > { %863 = vmatpush3.bf16.msra.mxu0 %v238_v11  ;;  %869 = vmatpush3.bf16.msra.mxu1 %v283_v12 }
  0x96   : > { %v328_v15 = vpop.permute.xlu1 %327  ;;  %v326_v16 = vpop.permute.xlu0 %325  ;;  %874 = vmatprep.subr.bf16.mxu0 %v1039_v0  ;;  %880 = vmatprep.subr.bf16.mxu1 %v1039_v0 }
  0x97   : > { %v332_v17 = vsel %vm329_vm4, %v326_v16, %v328_v15 }
  0x98   : > { %v336_v18 = vsel %vm237_vm3, %v332_v17, 0  ;;  %865 = vmatmul.mubr.msk.bf16.vlgmr.msra.gmra.mrb[0].mxu0 %vm222_vm2, %v206_v13  ;;  %871 = vmatmul.mubr.msk.bf16.vlgmr.msra.gmra.mrb[0].mxu1 %vm222_vm2, %v205_v14 }
  0x99   : > { %875 = vmatpush3.bf16.msra.mxu0 %v336_v18  ;;  %876 = vmatprep.mubr.msk.bf16.mxu0 %vm1040_vm0, %v1039_v0 }
  0x9a   : > { %v382_v19 = vpop.permute.xlu1 %381  ;;  %v380_v20 = vpop.permute.xlu0 %379  ;;  %886 = vmatprep.subr.bf16.mxu0 %v1039_v0  ;;  %882 = vmatprep.mubr.msk.bf16.mxu1 %vm1040_vm0, %v1039_v0 }
  0x9b   : > { %v386_v21 = vsel %vm383_vm5, %v380_v20, %v382_v19 }
  0x9c   : > { %v390_v22 = vsel %vm237_vm3, %v386_v21, 0 }
  0x9d   : > { %881 = vmatpush3.bf16.msra.mxu1 %v390_v22 }
  0x9e   : > { %v483_v26 = vpop.permute.xlu1 %482  ;;  %v481_v27 = vpop.permute.xlu0 %480  ;;  %892 = vmatprep.subr.bf16.mxu1 %v1039_v0 }
  0x9f   : > { %v487_v28 = vsel %vm484_vm6, %v481_v27, %v483_v26 }
  0xa0   : > { %877 = vmatmul.mubr.msk.bf16.vlgmr.msra.gmra.mrb[4].mxu0 %vm222_vm2, %v207_v23  ;;  %883 = vmatmul.mubr.msk.bf16.vlgmr.msra.gmra.mrb[4].mxu1 %vm222_vm2, %v208_v24  ;;  %v491_v29 = vsel %vm237_vm3, %v487_v28, 0 }
  0xa1   : > { %887 = vmatpush3.bf16.msra.mxu0 %v437_v25  ;;  %893 = vmatpush3.bf16.msra.mxu1 %v491_v29 }
  0xa2   : > { %v537_v30 = vpop.permute.xlu1 %536  ;;  %v535_v31 = vpop.permute.xlu0 %534  ;;  %888 = vmatprep.mubr.msk.bf16.mxu0 %vm1040_vm0, %v1039_v0  ;;  %898 = vmatprep.subr.bf16.mxu0 %v1039_v0 }
  0xa3   : > { %v541_v32 = vsel %vm538_vm7, %v535_v31, %v537_v30  ;;  %894 = vmatprep.mubr.msk.bf16.mxu1 %vm1040_vm0, %v1039_v0  ;;  %904 = vmatprep.subr.bf16.mxu1 %v1039_v0 }
  0xa4   : > { %v545_v35 = vsel %vm237_vm3, %v541_v32, 0 }
  0xa6   : > { %v591_v36 = vpop.permute.xlu1 %590  ;;  %v589_v37 = vpop.permute.xlu0 %588 }
  0xa7   : > { %v595_v38 = vsel %vm592_vm8, %v589_v37, %v591_v36 }
  0xa8   : > { %889 = vmatmul.mubr.msk.bf16.vlgmr.msra.gmra.mrb[8].mxu0 %vm222_vm2, %v209_v33  ;;  %895 = vmatmul.mubr.msk.bf16.vlgmr.msra.gmra.mrb[8].mxu1 %vm222_vm2, %v210_v34  ;;  %v599_v39 = vsel %vm237_vm3, %v595_v38, 0 }
  0xa9   : > { %899 = vmatpush3.bf16.msra.mxu0 %v545_v35  ;;  %905 = vmatpush3.bf16.msra.mxu1 %v599_v39 }
  0xaa   : > { %v645_v40 = vpop.permute.xlu1 %644  ;;  %v643_v41 = vpop.permute.xlu0 %642  ;;  %900 = vmatprep.mubr.msk.bf16.mxu0 %vm1040_vm0, %v1039_v0  ;;  %910 = vmatprep.subr.bf16.mxu0 %v1039_v0 }
  0xab   : > { %v649_v42 = vsel %vm646_vm9, %v643_v41, %v645_v40  ;;  %906 = vmatprep.mubr.msk.bf16.mxu1 %vm1040_vm0, %v1039_v0 }
  0xac   : > { %v653_v45 = vsel %vm237_vm3, %v649_v42, 0 }
  0xb0   : > { %901 = vmatmul.mubr.msk.bf16.vlgmr.msra.gmra.mrb[12].mxu0 %vm222_vm2, %v211_v43  ;;  %907 = vmatmul.mubr.msk.bf16.vlgmr.msra.gmra.mrb[12].mxu1 %vm222_vm2, %v212_v44 }
  0xb1   : > { %911 = vmatpush3.bf16.msra.mxu0 %v653_v45  ;;  %912 = vmatprep.mubr.msk.bf16.mxu0 %vm1040_vm0, %v1039_v0 }
  0xb8   : > { %913 = vmatmul.mubr.msk.bf16.vlgmr.msra.gmra.mrb[16].mxu0 %vm222_vm2, %v213_v46 }
  0xbb   : > { %v699_v23 = vpop.permute.xlu0 %698 }
 0x16b   : > { %v274_v47 = vpop.f32.mrb[0].mxu0  ;;  %v319_v48 = vpop.f32.mrb[0].mxu1 }
 0x16c   : > { %v866_v49 = vpop.f32.mrb[1].mxu0  ;;  %v320_v50 = vadd.f32 %v319_v48, %v274_v47  ;;  %v872_v51 = vpop.f32.mrb[1].mxu1 }
 0x16d   : > { %v277_v52 = vpop.f32.mrb[2].mxu0  ;;  %v322_v53 = vpop.f32.mrb[2].mxu1 }
 0x16e   : > { %v867_v54 = vpop.f32.mrb[3].mxu0  ;;  %v873_v55 = vpop.f32.mrb[3].mxu1 }
 0x173   : > { %v372_v56 = vpop.f32.mrb[4].mxu0  ;;  %v426_v57 = vpop.f32.mrb[4].mxu1 }
 0x174   : > { %v378_v58 = vadd.f32 %v372_v56, %v320_v50  ;;  %v878_v59 = vpop.f32.mrb[5].mxu0  ;;  %v884_v60 = vpop.f32.mrb[5].mxu1 }
 0x175   : > { %v375_v61 = vpop.f32.mrb[6].mxu0  ;;  %v429_v62 = vpop.f32.mrb[6].mxu1 }
 0x176   : > { %v432_v63 = vadd.f32 %v426_v57, %v378_v58  ;;  %v879_v0 = vpop.f32.mrb[7].mxu0  ;;  %v885_v1 = vpop.f32.mrb[7].mxu1 }
 0x17b   : > { %v473_v2 = vpop.f32.mrb[8].mxu0  ;;  %v527_v3 = vpop.f32.mrb[8].mxu1 }
 0x17c   : > { %v479_v4 = vadd.f32 %v473_v2, %v432_v63  ;;  %v890_v5 = vpop.f32.mrb[9].mxu0  ;;  %v896_v6 = vpop.f32.mrb[9].mxu1 }
 0x17d   : > { %v476_v7 = vpop.f32.mrb[10].mxu0  ;;  %v530_v8 = vpop.f32.mrb[10].mxu1 }
 0x17e   : > { %v533_v9 = vadd.f32 %v527_v3, %v479_v4  ;;  %v891_v10 = vpop.f32.mrb[11].mxu0  ;;  %v897_v11 = vpop.f32.mrb[11].mxu1 }
 0x183   : > { %v581_v12 = vpop.f32.mrb[12].mxu0  ;;  %v635_v13 = vpop.f32.mrb[12].mxu1 }
 0x184   : > { %v587_v14 = vadd.f32 %v581_v12, %v533_v9  ;;  %v902_v15 = vpop.f32.mrb[13].mxu0  ;;  %v908_v16 = vpop.f32.mrb[13].mxu1 }
 0x185   : > { %v584_v17 = vpop.f32.mrb[14].mxu0  ;;  %v638_v18 = vpop.f32.mrb[14].mxu1 }
 0x186   : > { %v641_v19 = vadd.f32 %v635_v13, %v587_v14  ;;  %v903_v20 = vpop.f32.mrb[15].mxu0  ;;  %v909_v21 = vpop.f32.mrb[15].mxu1 }
 0x18b   : > { %v689_v22 = vpop.f32.mrb[16].mxu0 }
 0x18c   : > { %v695_v24 = vadd.f32 %v689_v22, %v641_v19  ;;  %v914_v25 = vpop.f32.mrb[17].mxu0 }
 0x18d   : > { %v692_v26 = vpop.f32.mrb[18].mxu0 }
 0x18e   : > { %v701_v27 = vadd.f32 %v699_v23, %v695_v24  ;;  %v915_v28 = vpop.f32.mrb[19].mxu0 }
 0x190   : > { %v702_v29 = vmax.f32 %v701_v27, 0.0 }
 0x192   : > { %v703_v30 = vpack.c.bf16 %v702_v29, %v702_v29  ;;  %v707_v31 = vsel %vm706_vm10, %v702_v29, 0.0  ;;  %v711_v32 = vmul.f32 %v702_v29, %v702_v29 }
 0x193   : > { %708 = vadd.xlane.f32.xlu1 %v707_v31 }
 0x194   : > { %v712_v33 = vsel %vm706_vm10, %v711_v32, 0.0  ;;  %705 = vst.msk [vmem:[%s189_s14] sm:$0x3] %vm704_vm11, %v703_v30 }
 0x195   : > { %713 = vadd.xlane.f32.xlu0 %v712_v33 }
 0x196   : > { %988 = shalt.err (!%p985_p3)
}
 0x197   : > { %s989_s19 = scalar_lea.hbm %s1242_s30, 32  ;;  %s993_s12 = scalar_lea.hbm %s1286_s3, 64 }
 0x198   : > { %p990_p4 = scmp.ne.s32.totalorder %s1242_s30, %s989_s19  ;;  %p994_p9 = scmp.lt.u32.totalorder %s1242_s30, %s1286_s3 }
 0x199   : > { %p995_p10 = scmp.lt.u32.totalorder %s993_s12, %s989_s19  ;;  %p997_p12 = scmp.lt.u32.totalorder %s989_s19, %s1242_s30 }
 0x19a   : > { %p991_p7 = pnand %p990_p4, %p1122_p5 }
 0x19b   : > { %p996_p11 = por %p995_p10, %p994_p9 }
 0x19c   : > { %p992_p8 = pneg %p991_p7 }
 0x19d   : > { %p998_p13 = por %p997_p12, %p996_p11 }
 0x19f   : > { %p999_p0 = pnand %p998_p13, %p992_p8 }
 0x1a1   : > { %1002 = shalt.err (!%p999_p0)
}
 0x1a2   : > { %916 = dma.vmem_to_hbm [thread:$0]  (%p1122_p5), %s739_s22, 32, %s1242_s30, %s721_s5   ;;  %vm716_vm12 = vcmask 3072   ;;  %vm718_vm13 = vcmask 11272  }
 0x1a3   : > { %s203_s29 = scalar_lea.vmem %s1287_s4, %s829_s28 }
 0x220   : > { %v709_v34 = vpop.xlane.xlu1 %708 }
 0x221   : > { %717 = vst.msk [vmem:[%s203_s29] sm:$0xf] %vm716_vm12, %v709_v34 }
 0x222   : > { %v714_v35 = vpop.xlane.xlu0 %713 }
 0x223   : > { %719 = vst.msk [vmem:[%s203_s29] sm:$0xf] %vm718_vm13, %v714_v35 }
 0x224 PF: > { %p922_p1 = scmp.ge.s32.totalorder %s1037_s18, 2  ;;  %s753_s25 = sand.u32 1, %s1025_s15  }
 0x225   : > { %s754_s22 = scalar_lea.sflag [#allocation3], %s753_s25 }
 0x226   : > { %p919_p2 = pnand %p922_p1, %p1126_p6 }
 0x228   : > { %1020 = dma.done.wait (!%p919_p2), %s754_s22, 32  }
 0x229   : > { %1022 = vsyncadd (!%p919_p2), %s754_s22, 4294967264  ;;  %p15_p5 = scmp.ge.s32.totalorder %s1109_s21, 4   ;;  %s1290_s15 = smov %s1029_s16 }
 0x22a   : > { %s1291_s16 = smov %s1033_s17  ;;  %s1292_s17 = smov %s1120_s24 }
 0x22b   : > { %s1293_s18 = smov %s1109_s21  ;;  %17 = sbr.rel (!%p15_p5) target bundleno = 3 (0x3), region = 79 }
 0x232   :  { %766 = vsyncpa [#allocation3], 1 }
 0x233   :  { %768 = vsyncpa [#allocation3 + $0x1], 1 }

</bundles_post_ra>
